<compile_context>
chip_gen: v7x
topology: tpu7x:2x2x1
jax: 0.10.0
libtpu: 0.0.40
codegen_flags: <defaults>
</compile_context>

<pallas_src>
import math
import functools
import jax
import jax.numpy as jnp
from jax.experimental import pallas as pl
from jax.experimental.pallas import tpu as pltpu

LANE = 128


def _round_up(x, m):
    return ((x + m - 1) // m) * m


def _num_tensorcores():
    """Best-effort TensorCore count of the default device (1 on v5e/v6e)."""
    try:
        dev = jax.devices()[0]
        for attr in ("num_cores", "core_count"):
            n = getattr(dev, attr, None)
            if n:
                return int(n)
    except Exception:
        pass
    return 1


def _pick_batch_tile(batch, row_bytes):
    """Rows per grid step.  Split across cores only when >=2 TensorCores exist
    (v7x megacore); always guarantee batch % tile == 0; cap the tile so the
    double-buffered activation blocks stay well under the VMEM limit."""
    tb = batch
    if _num_tensorcores() >= 2 and batch >= 512 and batch % 16 == 0:
        tb = batch // 2
    # VMEM cap: keep per-buffer activation blocks around <= 8 MiB.
    cap = max(8, (8 * 1024 * 1024) // max(row_bytes, 1))
    cap = max(8, (cap // 8) * 8)
    if tb > cap:
        for cand in range(cap, 7, -8):           # multiples of 8, sublane aligned
            if batch % cand == 0:
                tb = cand
                break
    if batch % tb != 0:                          # correctness first: never drop rows
        tb = batch
    return tb


def _rnn_seq_kernel(x_ref, h0_ref, w_ih_ref, w_hh_ref, b_cell_ref,
                    w_out_ref, b_out_ref, otp_ref, hid_ref, h_scr):
    """One sequence step per grid point along axis 1; hidden carried in VMEM."""
    t = pl.program_id(1)

    @pl.when(t == 0)
    def _():
        h_scr[...] = h0_ref[...]                 # load padded initial hidden once

    x = x_ref[0].astype(w_ih_ref.dtype)          # (TB, I)
    h_prev = h_scr[...]                          # (TB, HP) f32

    # Recurrent cell: two small MXU matmuls, f32 accumulation, f32 epilogue.
    pre = (jnp.dot(x, w_ih_ref[...], preferred_element_type=jnp.float32)
           + jnp.dot(h_prev.astype(w_hh_ref.dtype), w_hh_ref[...],
                     preferred_element_type=jnp.float32)
           + b_cell_ref[...])
    h_new = jnp.tanh(pre)                        # (TB, HP) f32, lane-dense
    h_scr[...] = h_new

    # Output layer on the lane-padded hidden state; padded rows/cols are zero.
    otp = (jnp.dot(h_new.astype(w_out_ref.dtype), w_out_ref[...],
                   preferred_element_type=jnp.float32)
           + b_out_ref[...])
    otp_ref[...] = otp.astype(otp_ref.dtype)[None]      # unmasked (1, TB, OP) store

    @pl.when(t == pl.num_programs(1) - 1)
    def _():
        hid_ref[...] = h_new.astype(hid_ref.dtype)       # final hidden, once per b-tile


def pack_params(params, matmul_dtype=jnp.bfloat16):
    """One-time host-side packing: zero-pad hidden/output feature dims to 128
    lanes and cast matmul weights to `matmul_dtype` (f32 accumulation stays via
    preferred_element_type)."""
    w_ih, w_hh, b_rnn, w_out, b_out = params
    I, H = w_ih.shape
    O = w_out.shape[1]
    HP = _round_up(H, LANE)
    OP = _round_up(O, LANE)

    w_ih_p = jnp.zeros((I, HP), jnp.float32).at[:, :H].set(w_ih)
    w_hh_p = jnp.zeros((HP, HP), jnp.float32).at[:H, :H].set(w_hh)
    b_cell = jnp.zeros((1, HP), jnp.float32).at[0, :H].set(b_rnn)
    w_out_p = jnp.zeros((HP, OP), jnp.float32).at[:H, :O].set(w_out)
    b_outp = jnp.zeros((1, OP), jnp.float32).at[0, :O].set(b_out)

    return (w_ih_p.astype(matmul_dtype), w_hh_p.astype(matmul_dtype), b_cell,
            w_out_p.astype(matmul_dtype), b_outp, (I, H, O))


@functools.partial(jax.jit, static_argnames=("dims",))
def _forward_seq_packed(x_seq, hidden_in, w_ih, w_hh, b_cell, w_out, b_out, *, dims):
    I, H, O = dims
    T, B, _ = x_seq.shape
    HP = w_ih.shape[1]
    OP = w_out.shape[1]

    # Pad hidden to the lane-dense layout once per sequence call.
    h0 = jnp.zeros((B, HP), jnp.float32).at[:, :H].set(hidden_in)

    row_bytes = 4 * (I + 2 * HP + OP)
    TB = _pick_batch_tile(B, row_bytes)
    grid = (B // TB, T)

    wdt = jnp.dtype(w_ih.dtype).itemsize
    cost = pl.CostEstimate(
        flops=2 * T * B * (I * HP + HP * HP + HP * OP),
        transcendentals=T * B * HP,
        bytes_accessed=(x_seq.size * 4 + h0.size * 4
                        + (w_ih.size + w_hh.size + w_out.size) * wdt
                        + (b_cell.size + b_out.size) * 4
                        + T * B * OP * 4 + B * HP * 4),
    )

    otp_pad, hid_pad = pl.pallas_call(
        _rnn_seq_kernel,
        grid=grid,
        in_specs=[
            pl.BlockSpec((1, TB, I), lambda b, t: (t, b, 0)),    # x_t stream
            pl.BlockSpec((TB, HP), lambda b, t: (b, 0)),         # padded h0
            pl.BlockSpec((I, HP), lambda b, t: (0, 0)),          # weights stay
            pl.BlockSpec((HP, HP), lambda b, t: (0, 0)),         #   resident in
            pl.BlockSpec((1, HP), lambda b, t: (0, 0)),          #   VMEM across
            pl.BlockSpec((HP, OP), lambda b, t: (0, 0)),         #   the grid
            pl.BlockSpec((1, OP), lambda b, t: (0, 0)),
        ],
        out_specs=[
            pl.BlockSpec((1, TB, OP), lambda b, t: (t, b, 0)),   # lane-dense otp
            pl.BlockSpec((TB, HP), lambda b, t: (b, 0)),         # final hidden
        ],
        out_shape=[
            jax.ShapeDtypeStruct((T, B, OP), jnp.float32),
            jax.ShapeDtypeStruct((B, HP), jnp.float32),
        ],
        scratch_shapes=[pltpu.VMEM((TB, HP), jnp.float32)],      # carried hidden
        compiler_params=pltpu.CompilerParams(
            dimension_semantics=("parallel", "arbitrary"),
            vmem_limit_bytes=32 * 1024 * 1024,
        ),
        cost_estimate=cost,
    )(x_seq, h0, w_ih, w_hh, b_cell, w_out, b_out)

    # Single slice per sequence call (not per step) to drop lane padding.
    return otp_pad[..., :O], hid_pad[:, :H]


def rnn_model_forward_seq(x_seq, hidden_in, packed_params):
    """Run T steps of RNNModel('VanillaRNN') in one Pallas call.
    Returns (otp per step (T,B,O), final hidden (B,H))."""
    w_ih, w_hh, b_cell, w_out, b_out, dims = packed_params
    return _forward_seq_packed(x_seq, hidden_in, w_ih, w_hh, b_cell, w_out, b_out,
                               dims=dims)


def rnn_model_forward(inp, hidden_in, packed_params):
    """Single-step forward, exactly matching RNNModel.forward -> (otp, hid_out)."""
    otp_seq, hid = rnn_model_forward_seq(inp[None], hidden_in, packed_params)
    return otp_seq[0], hid


def init_params(key, input_size, hidden_size, output_size):
    """Deterministic init mirroring the PyTorch module's shapes.
    VanillaRNNCell: uniform(-1/sqrt(H), 1/sqrt(H)); Linear weight stored as (H, O)."""
    k1, k2, k3, k4, k5 = jax.random.split(key, 5)
    stdv = 1.0 / math.sqrt(hidden_size)
    w_ih = jax.random.uniform(k1, (input_size, hidden_size), jnp.float32, -stdv, stdv)
    w_hh = jax.random.uniform(k2, (hidden_size, hidden_size), jnp.float32, -stdv, stdv)
    b_rnn = jax.random.uniform(k3, (hidden_size,), jnp.float32, -stdv, stdv)
    w_out = jax.random.uniform(k4, (hidden_size, output_size), jnp.float32, -stdv, stdv)
    b_out = jax.random.uniform(k5, (output_size,), jnp.float32, -stdv, stdv)
    return (w_ih, w_hh, b_rnn, w_out, b_out)


def reference_forward(inp, hidden_in, params):
    """Pure-JAX f32 reference of one module forward (mirrors PyTorch exactly)."""
    w_ih, w_hh, b_rnn, w_out, b_out = params
    h_new = jnp.tanh(inp @ w_ih + hidden_in @ w_hh + b_rnn)
    otp = h_new @ w_out + b_out
    return otp, h_new


def reference_forward_seq(x_seq, hidden_in, params):
    """Pure-JAX reference of T repeated module forwards."""
    def step(h, x):
        otp, h_new = reference_forward(x, h, params)
        return h_new, otp
    h_final, otps = jax.lax.scan(step, hidden_in, x_seq)
    return otps, h_final


if __name__ == "__main__":
    seq_len = 8
    batch = 8
    input_size = 16
    hidden_size = 32
    output_size = 10

    key = jax.random.PRNGKey(0)
    k_inp, k_par = jax.random.split(key)

    params = init_params(k_par, input_size, hidden_size, output_size)
    x_seq = jax.random.normal(k_inp, (seq_len, batch, input_size), jnp.float32)
    # RNNModel.init_hidden for VanillaRNN -> zeros(batch, hidden)
    hidden0 = jnp.zeros((batch, hidden_size), jnp.float32)

    ref_otp1, ref_hid1 = reference_forward(x_seq[0], hidden0, params)
    ref_otp_seq, ref_hid_seq = reference_forward_seq(x_seq, hidden0, params)

    # Exact path (f32 weights): tight single-step check of the module forward,
    # then the full in-kernel sequence recurrence.
    packed_f32 = pack_params(params, matmul_dtype=jnp.float32)
    otp1, hid1 = rnn_model_forward(x_seq[0], hidden0, packed_f32)
    jax.block_until_ready((otp1, hid1))
    assert jnp.allclose(otp1, ref_otp1, atol=1e-4, rtol=1e-4)
    assert jnp.allclose(hid1, ref_hid1, atol=1e-4, rtol=1e-4)

    otp_seq32, hid_seq32 = rnn_model_forward_seq(x_seq, hidden0, packed_f32)
    jax.block_until_ready((otp_seq32, hid_seq32))
    assert jnp.allclose(otp_seq32, ref_otp_seq, atol=2e-3, rtol=2e-3)
    assert jnp.allclose(hid_seq32, ref_hid_seq, atol=2e-3, rtol=2e-3)

    # Fast path (bf16 MXU operands, f32 accumulation + f32 tanh/bias epilogue).
    packed_bf16 = pack_params(params, matmul_dtype=jnp.bfloat16)
    otp_seq, hid_seq = rnn_model_forward_seq(x_seq, hidden0, packed_bf16)
    jax.block_until_ready((otp_seq, hid_seq))
    assert jnp.allclose(otp_seq, ref_otp_seq, atol=5e-2, rtol=5e-2)
    assert jnp.allclose(hid_seq, ref_hid_seq, atol=5e-2, rtol=5e-2)

    # TODO(synk): other rnn_type branches (plainRNN/CTRNN/LSTM/GRU/RNNSTSP) are
    # not implemented; this kernel covers the 'VanillaRNN' configuration.
    print("KERNEL_OK")
</pallas_src>

<mosaic_0001>
module attributes {stable_mosaic.version = 11 : i64} {
  func.func @_rnn_seq_kernel(%arg0: i32, %arg1: i32, %arg2: memref<1x8x16xf32, #tpu.memory_space<vmem>>, %arg3: memref<8x128xf32, #tpu.memory_space<vmem>>, %arg4: memref<16x128xf32, #tpu.memory_space<vmem>>, %arg5: memref<128x128xf32, #tpu.memory_space<vmem>>, %arg6: memref<1x128xf32, #tpu.memory_space<vmem>>, %arg7: memref<128x128xf32, #tpu.memory_space<vmem>>, %arg8: memref<1x128xf32, #tpu.memory_space<vmem>>, %arg9: memref<1x8x128xf32, #tpu.memory_space<vmem>>, %arg10: memref<8x128xf32, #tpu.memory_space<vmem>>, %arg11: memref<8x128xf32, #tpu.memory_space<vmem>>) attributes {dimension_semantics = [#tpu.dimension_semantics<parallel>, #tpu.dimension_semantics<arbitrary>], iteration_bounds = array<i64: 1, 1>, scalar_prefetch = 0 : i64, scratch_operands = 1 : i64, tpu.core_type = #tpu.core_type<tc>, window_params = [{transform_indices = @transform_0, window_bounds = array<i64: 1, 8, 16>}, {transform_indices = @transform_1, window_bounds = array<i64: 8, 128>}, {pipeline_mode = #tpu.pipeline_mode<synchronous>, transform_indices = @transform_2, window_bounds = array<i64: 16, 128>}, {pipeline_mode = #tpu.pipeline_mode<synchronous>, transform_indices = @transform_3, window_bounds = array<i64: 128, 128>}, {pipeline_mode = #tpu.pipeline_mode<synchronous>, transform_indices = @transform_4, window_bounds = array<i64: 1, 128>}, {pipeline_mode = #tpu.pipeline_mode<synchronous>, transform_indices = @transform_5, window_bounds = array<i64: 128, 128>}, {pipeline_mode = #tpu.pipeline_mode<synchronous>, transform_indices = @transform_6, window_bounds = array<i64: 1, 128>}, {transform_indices = @transform_7, window_bounds = array<i64: 1, 8, 128>}, {transform_indices = @transform_8, window_bounds = array<i64: 8, 128>}]} {
    %c0_i32 = arith.constant 0 : i32
    %0 = arith.cmpi eq, %arg1, %c0_i32 : i32
    %1 = arith.extui %0 : i1 to i32
    %c0_i32_0 = arith.constant 0 : i32
    %2 = arith.cmpi ne, %1, %c0_i32_0 : i32
    scf.if %2 {
      %c0_24 = arith.constant 0 : index
      %c0_25 = arith.constant 0 : index
      %26 = vector.load %arg3[%c0_24, %c0_25] : memref<8x128xf32, #tpu.memory_space<vmem>>, vector<8x128xf32>
      %c0_26 = arith.constant 0 : index
      %c0_27 = arith.constant 0 : index
      %27 = vector.load %arg11[%c0_26, %c0_27] : memref<8x128xf32, #tpu.memory_space<vmem>>, vector<8x128xf32>
      tpu.vector_store %arg11[%c0_26, %c0_27], %26 {strides = array<i32>} : memref<8x128xf32, #tpu.memory_space<vmem>>, vector<8x128xf32>,
    } else {
    }
    %c0 = arith.constant 0 : index
    %c0_1 = arith.constant 0 : index
    %c0_2 = arith.constant 0 : index
    %3 = vector.load %arg2[%c0, %c0_1, %c0_2] : memref<1x8x16xf32, #tpu.memory_space<vmem>>, vector<1x8x16xf32>
    %4 = vector.shape_cast %3 : vector<1x8x16xf32> to vector<8x16xf32>
    %c0_3 = arith.constant 0 : index
    %c0_4 = arith.constant 0 : index
    %5 = vector.load %arg11[%c0_3, %c0_4] : memref<8x128xf32, #tpu.memory_space<vmem>>, vector<8x128xf32>
    %c0_5 = arith.constant 0 : index
    %c0_6 = arith.constant 0 : index
    %6 = vector.load %arg4[%c0_5, %c0_6] : memref<16x128xf32, #tpu.memory_space<vmem>>, vector<16x128xf32>
    %cst = arith.constant dense<0.000000e+00> : vector<8x128xf32>
    %7 = tpu.matmul %4, %6, %cst {dimension_numbers = #tpu.dot_dimension_numbers<[1], [0], [0], [1], [0, 0, 1, 1], [], []>} : vector<8x16xf32>, vector<16x128xf32>, vector<8x128xf32> -> vector<8x128xf32>
    %c0_7 = arith.constant 0 : index
    %c0_8 = arith.constant 0 : index
    %8 = vector.load %arg5[%c0_7, %c0_8] : memref<128x128xf32, #tpu.memory_space<vmem>>, vector<128x128xf32>
    %cst_9 = arith.constant dense<0.000000e+00> : vector<8x128xf32>
    %9 = tpu.matmul %5, %8, %cst_9 {dimension_numbers = #tpu.dot_dimension_numbers<[1], [0], [0], [1], [0, 0, 1, 1], [], []>} : vector<8x128xf32>, vector<128x128xf32>, vector<8x128xf32> -> vector<8x128xf32>
    %10 = arith.addf %7, %9 : vector<8x128xf32>
    %c0_10 = arith.constant 0 : index
    %c0_11 = arith.constant 0 : index
    %11 = vector.load %arg6[%c0_10, %c0_11] : memref<1x128xf32, #tpu.memory_space<vmem>>, vector<1x128xf32>
    %12 = vector.broadcast %11 : vector<1x128xf32> to vector<8x128xf32>
    %13 = arith.addf %10, %12 : vector<8x128xf32>
    %14 = math.tanh %13 : vector<8x128xf32>
    %c0_12 = arith.constant 0 : index
    %c0_13 = arith.constant 0 : index
    %15 = vector.load %arg11[%c0_12, %c0_13] : memref<8x128xf32, #tpu.memory_space<vmem>>, vector<8x128xf32>
    tpu.vector_store %arg11[%c0_12, %c0_13], %14 {strides = array<i32>} : memref<8x128xf32, #tpu.memory_space<vmem>>, vector<8x128xf32>,
    %c0_14 = arith.constant 0 : index
    %c0_15 = arith.constant 0 : index
    %16 = vector.load %arg7[%c0_14, %c0_15] : memref<128x128xf32, #tpu.memory_space<vmem>>, vector<128x128xf32>
    %cst_16 = arith.constant dense<0.000000e+00> : vector<8x128xf32>
    %17 = tpu.matmul %14, %16, %cst_16 {dimension_numbers = #tpu.dot_dimension_numbers<[1], [0], [0], [1], [0, 0, 1, 1], [], []>} : vector<8x128xf32>, vector<128x128xf32>, vector<8x128xf32> -> vector<8x128xf32>
    %c0_17 = arith.constant 0 : index
    %c0_18 = arith.constant 0 : index
    %18 = vector.load %arg8[%c0_17, %c0_18] : memref<1x128xf32, #tpu.memory_space<vmem>>, vector<1x128xf32>
    %19 = vector.broadcast %18 : vector<1x128xf32> to vector<8x128xf32>
    %20 = arith.addf %17, %19 : vector<8x128xf32>
    %21 = vector.shape_cast %20 : vector<8x128xf32> to vector<1x8x128xf32>
    %c0_19 = arith.constant 0 : index
    %c0_20 = arith.constant 0 : index
    %c0_21 = arith.constant 0 : index
    %22 = vector.load %arg9[%c0_19, %c0_20, %c0_21] : memref<1x8x128xf32, #tpu.memory_space<vmem>>, vector<1x8x128xf32>
    tpu.vector_store %arg9[%c0_19, %c0_20, %c0_21], %21 {strides = array<i32>} : memref<1x8x128xf32, #tpu.memory_space<vmem>>, vector<1x8x128xf32>,
    %c0_i32_22 = arith.constant 0 : i32
    %23 = arith.cmpi eq, %arg1, %c0_i32_22 : i32
    %24 = arith.extui %23 : i1 to i32
    %c0_i32_23 = arith.constant 0 : i32
    %25 = arith.cmpi ne, %24, %c0_i32_23 : i32
    scf.if %25 {
      %c0_24 = arith.constant 0 : index
      %c0_25 = arith.constant 0 : index
      %26 = vector.load %arg10[%c0_24, %c0_25] : memref<8x128xf32, #tpu.memory_space<vmem>>, vector<8x128xf32>
      tpu.vector_store %arg10[%c0_24, %c0_25], %14 {strides = array<i32>} : memref<8x128xf32, #tpu.memory_space<vmem>>, vector<8x128xf32>,
    } else {
    }
    return
  }
  func.func @transform_0(%arg0: i32, %arg1: i32) -> (i32, i32, i32) {
    %c0_i32 = arith.constant 0 : i32
    %c0_i32_0 = arith.constant 0 : i32
    return %arg1, %arg0, %c0_i32 : i32, i32, i32
  }
  func.func @transform_1(%arg0: i32, %arg1: i32) -> (i32, i32) {
    %c0_i32 = arith.constant 0 : i32
    %c0_i32_0 = arith.constant 0 : i32
    return %arg0, %c0_i32 : i32, i32
  }
  func.func @transform_2(%arg0: i32, %arg1: i32) -> (i32, i32) {
    %c0_i32 = arith.constant 0 : i32
    %c0_i32_0 = arith.constant 0 : i32
    %c0_i32_1 = arith.constant 0 : i32
    return %c0_i32, %c0_i32_0 : i32, i32
  }
  func.func @transform_3(%arg0: i32, %arg1: i32) -> (i32, i32) {
    %c0_i32 = arith.constant 0 : i32
    %c0_i32_0 = arith.constant 0 : i32
    %c0_i32_1 = arith.constant 0 : i32
    return %c0_i32, %c0_i32_0 : i32, i32
  }
  func.func @transform_4(%arg0: i32, %arg1: i32) -> (i32, i32) {
    %c0_i32 = arith.constant 0 : i32
    %c0_i32_0 = arith.constant 0 : i32
    %c0_i32_1 = arith.constant 0 : i32
    return %c0_i32, %c0_i32_0 : i32, i32
  }
  func.func @transform_5(%arg0: i32, %arg1: i32) -> (i32, i32) {
    %c0_i32 = arith.constant 0 : i32
    %c0_i32_0 = arith.constant 0 : i32
    %c0_i32_1 = arith.constant 0 : i32
    return %c0_i32, %c0_i32_0 : i32, i32
  }
  func.func @transform_6(%arg0: i32, %arg1: i32) -> (i32, i32) {
    %c0_i32 = arith.constant 0 : i32
    %c0_i32_0 = arith.constant 0 : i32
    %c0_i32_1 = arith.constant 0 : i32
    return %c0_i32, %c0_i32_0 : i32, i32
  }
  func.func @transform_7(%arg0: i32, %arg1: i32) -> (i32, i32, i32) {
    %c0_i32 = arith.constant 0 : i32
    %c0_i32_0 = arith.constant 0 : i32
    return %arg1, %arg0, %c0_i32 : i32, i32, i32
  }
  func.func @transform_8(%arg0: i32, %arg1: i32) -> (i32, i32) {
    %c0_i32 = arith.constant 0 : i32
    %c0_i32_0 = arith.constant 0 : i32
    return %arg0, %c0_i32 : i32, i32
  }
}

</mosaic_0001>

<bundles_post_ra>
// kernel: _forward_seq_packed.1
= control target key start
LH: loop header
LB: loop body
LE: loop exit
PB: predicated region body
PF: predicated region fallthrough
CT: control target
= control target key end

     0   :  { %14 = vsyncpa [#allocation4], 0  ;;  %s781_s0 = inlined_call_operand.vmem [shape: f32[1,8,16], index: 0, kind: input, shape index: {}]   ;;  %s782_s1 = inlined_call_operand.vmem [shape: f32[8,128], index: 1, kind: input, shape index: {}]   ;;  %s783_s2 = inlined_call_operand.vmem [shape: f32[16,128], index: 2, kind: input, shape index: {}]   ;;  %s784_s3 = inlined_call_operand.hbm [shape: f32[128,128], index: 3, kind: input, shape index: {}]   ;;  %s785_s4 = inlined_call_operand.vmem [shape: f32[1,128], index: 4, kind: input, shape index: {}]   ;;  %s786_s5 = inlined_call_operand.hbm [shape: f32[128,128], index: 5, kind: input, shape index: {}]   ;;  %s787_s6 = inlined_call_operand.vmem [shape: f32[1,128], index: 6, kind: input, shape index: {}]   ;;  %s788_s7 = inlined_call_operand.hbm [shape: f32[1,8,128], index: 7, kind: output, shape index: {0}]   ;;  %s789_s8 = inlined_call_operand.hbm [shape: f32[8,128], index: 8, kind: output, shape index: {1}]  }
   0x1   :  { %15 = vsyncpa [#allocation7], 0 }
   0x2   :  { %16 = vsyncpa [#allocation5], 0 }
   0x3   :  { %17 = vsyncpa [#allocation10], 0  ;;  %s641_s27 = smov [#allocation3]   ;;  %s545_s9 = scalar_lea.hbm %s784_s3, 2048 }
   0x4   :  { %s29_s28 = sshll.u32 %s641_s27, 4  ;;  %p546_p0 = scmp.ne.s32.totalorder %s784_s3, %s545_s9  ;;  %s30_s28 = int_to_ptr.vmem [resolvable:$true] %s29_s28 }
   0x5   :  { %p549_p1 = scmp.lt.u32.totalorder %s545_s9, %s784_s3 }
   0x7   :  { %p551_p2 = pnand %p549_p1, %p546_p0 }
   0x9   :  { %554 = shalt.err (!%p551_p2)
}
   0xa   :  { %s555_s14 = scalar_lea.vmem %s30_s28, 2048  ;;  %p560_p4 = scmp.lt.s32.totalorder %s30_s28, %s30_s28 }
   0xb   :  { %p556_p3 = scmp.ne.s32.totalorder %s30_s28, %s555_s14  ;;  %p561_p5 = scmp.lt.s32.totalorder %s555_s14, %s555_s14 }
   0xd   :  { %p562_p6 = por %p561_p5, %p560_p4 }
   0xf   :  { %p563_p7 = pnand %p562_p6, %p556_p3 }
  0x11   :  { %566 = shalt.err (!%p563_p7)
}
  0x12   :  { %s642_s15 = smov 128   ;;  %s643_s16 = smov 8  }
  0x13   :  { %35 = dma.hbm_to_vmem [thread:$0]  %s784_s3, 2048, %s30_s28, [#allocation4], %s642_s15, %s642_s15, %s643_s16  }
  0x14   :  { %s644_s19 = smov [#allocation6]   ;;  %s567_s23 = scalar_lea.hbm %s786_s5, 2048 }
  0x15   :  { %s43_s20 = sshll.u32 %s644_s19, 4  ;;  %p568_p8 = scmp.ne.s32.totalorder %s786_s5, %s567_s23  ;;  %s44_s20 = int_to_ptr.vmem [resolvable:$true] %s43_s20 }
  0x16   :  { %p571_p9 = scmp.lt.u32.totalorder %s567_s23, %s786_s5 }
  0x18   :  { %p573_p10 = pnand %p571_p9, %p568_p8 }
  0x1a   :  { %576 = shalt.err (!%p573_p10)
}
  0x1b   :  { %s577_s29 = scalar_lea.vmem %s44_s20, 2048  ;;  %p582_p12 = scmp.lt.s32.totalorder %s44_s20, %s44_s20 }
  0x1c   :  { %p578_p11 = scmp.ne.s32.totalorder %s44_s20, %s577_s29  ;;  %p583_p13 = scmp.lt.s32.totalorder %s577_s29, %s577_s29 }
  0x1e   :  { %p584_p0 = por %p583_p13, %p582_p12 }
  0x20   :  { %p585_p1 = pnand %p584_p0, %p578_p11 }
  0x22   :  { %588 = shalt.err (!%p585_p1)
}
  0x23   :  { %49 = dma.hbm_to_vmem [thread:$0]  %s786_s5, 2048, %s44_s20, [#allocation7], %s642_s15, %s642_s15, %s643_s16  }
  0x24   :  { %633 = dma.done.wait [#allocation4], 2048  }
  0x25   :  { %634 = vsyncadd [#allocation4], 4294965248 }
  0x26   :  { %635 = dma.done.wait [#allocation7], 2048  }
  0x27   :  { %636 = vsyncadd [#allocation7], 4294965248  ;;  %v645_v0 = vmov 0.0|0.0   ;;  %vm646_vm0 = vmmov 0   ;;  %v647_v1 = vmov 0.0   ;;  %v68_v2 = vld [vmem:[#allocation3] sm:$0xff] }
  0x28   :  { %483 = vmatprep.subr.bf16.mxu0 %v645_v0  ;;  %507 = vmatprep.subr.bf16.mxu1 %v645_v0  ;;  %v69_v3 = vld [vmem:[#allocation3 + $0x8] sm:$0xff]  ;;  %v70_v4 = vld [vmem:[#allocation3 + $0x10] sm:$0xff]  ;;  %v71_v6 = vld [vmem:[#allocation3 + $0x18] sm:$0xff]  ;;  %vm154_vm1 = vcmask 130048   ;;  %s648_s14 = smov [#allocation9]  }
  0x29   :  { %445 = vmatprep.mubr.msk.f32.mxu1 %vm646_vm0, %v647_v1  ;;  %438 = vmatprep.mubr.msk.f32.mxu0 %vm646_vm0, %v647_v1  ;;  %v484_v5 = vpack.c.bf16 %v69_v3, %v68_v2  ;;  %v487_v7 = vpack.c.bf16 %v71_v6, %v70_v4  ;;  %v72_v8 = vld [vmem:[#allocation3 + $0x20] sm:$0xff]  ;;  %v73_v9 = vld [vmem:[#allocation3 + $0x28] sm:$0xff]  ;;  %v74_v16 = vld [vmem:[#allocation3 + $0x30] sm:$0xff]  ;;  %s352_s15 = sshll.u32 %s648_s14, 4  ;;  %s353_s15 = int_to_ptr.vmem [resolvable:$true] %s352_s15 }
  0x2a   :  { %v66_v10 = vld [vmem:[%s783_s2] sm:$0xff]  ;;  %v67_v11 = vld [vmem:[%s783_s2 + $0x8] sm:$0xff]  ;;  %v490_v14 = vpack.c.bf16 %v73_v9, %v72_v8  ;;  %v75_v17 = vld [vmem:[#allocation3 + $0x38] sm:$0xff]  ;;  %s589_s16 = scalar_lea.vmem %s353_s15, 128  ;;  %p594_p3 = scmp.lt.s32.totalorder %s353_s15, %s353_s15 }
  0x2b   :  { %485 = vmatpush3.bf16.msra.mxu0 %v484_v5  ;;  %v508_v12 = vpack.c.bf16 %v67_v11, %v66_v10  ;;  %v238_v13 = vld [vmem:[#allocation6] sm:$0xff]  ;;  %v239_v15 = vld [vmem:[#allocation6 + $0x8] sm:$0xff]  ;;  %v240_v20 = vld [vmem:[#allocation6 + $0x10] sm:$0xff]  ;;  %v493_v22 = vpack.c.bf16 %v75_v17, %v74_v16  ;;  %p590_p2 = scmp.ne.s32.totalorder %s353_s15, %s589_s16  ;;  %p595_p4 = scmp.lt.s32.totalorder %s589_s16, %s589_s16 }
  0x2c   :  { %486 = vmatprep.subr.bf16.mxu0 %v645_v0  ;;  %v64_v18 = vld [vmem:[%s781_s0] sm:$0xff]  ;;  %v511_v19 = vpack.c.bf16 %v239_v15, %v238_v13  ;;  %v241_v21 = vld [vmem:[#allocation6 + $0x18] sm:$0xff]  ;;  %v77_v24 = vld [vmem:[#allocation3 + $0x48] sm:$0xff] }
  0x2d   :  { %509 = vmatpush3.bf16.msra.mxu1 %v508_v12  ;;  %v76_v23 = vld [vmem:[#allocation3 + $0x40] sm:$0xff]  ;;  %v514_v25 = vpack.c.bf16 %v241_v21, %v240_v20  ;;  %v243_v27 = vld [vmem:[#allocation6 + $0x28] sm:$0xff]  ;;  %v78_v29 = vld [vmem:[#allocation3 + $0x50] sm:$0xff]  ;;  %p596_p5 = por %p595_p4, %p594_p3 }
  0x2e   :  { %510 = vmatprep.subr.bf16.mxu1 %v645_v0  ;;  %v242_v26 = vld [vmem:[#allocation6 + $0x20] sm:$0xff]  ;;  %v496_v28 = vpack.c.bf16 %v77_v24, %v76_v23  ;;  %v79_v30 = vld [vmem:[#allocation3 + $0x58] sm:$0xff]  ;;  %v244_v32 = vld [vmem:[#allocation6 + $0x30] sm:$0xff] }
  0x2f   :  { %488 = vmatpush3.bf16.msra.mxu0 %v487_v7  ;;  %v517_v31 = vpack.c.bf16 %v243_v27, %v242_v26  ;;  %v245_v33 = vld [vmem:[#allocation6 + $0x38] sm:$0xff]  ;;  %v499_v34 = vpack.c.bf16 %v79_v30, %v78_v29  ;;  %v80_v35 = vld [vmem:[#allocation3 + $0x60] sm:$0xff]  ;;  %v81_v36 = vld [vmem:[#allocation3 + $0x68] sm:$0xff]  ;;  %p597_p6 = pnand %p596_p5, %p590_p2 }
  0x30   :  { %489 = vmatprep.subr.bf16.mxu0 %v645_v0  ;;  %446 = vmatmul.mubr.msk.f32.vlgmr.msra.gmra.mrb[0].mxu1 %vm154_vm1, %v64_v18  ;;  %v520_v37 = vpack.c.bf16 %v245_v33, %v244_v32  ;;  %v502_v38 = vpack.c.bf16 %v81_v36, %v80_v35  ;;  %v82_v39 = vld [vmem:[#allocation3 + $0x70] sm:$0xff]  ;;  %v83_v40 = vld [vmem:[#allocation3 + $0x78] sm:$0xff]  ;;  %v62_v42 = vld [vmem:[%s782_s1] sm:$0xff] }
  0x31   :  { %512 = vmatpush3.bf16.msra.mxu1 %v511_v19  ;;  %480 = vmatprep.mubr.msk.f32.mxu1 %vm646_vm0, %v647_v1  ;;  %v505_v41 = vpack.c.bf16 %v83_v40, %v82_v39  ;;  %v246_v43 = vld [vmem:[#allocation6 + $0x40] sm:$0xff]  ;;  %v247_v44 = vld [vmem:[#allocation6 + $0x48] sm:$0xff]  ;;  %v248_v46 = vld [vmem:[#allocation6 + $0x50] sm:$0xff] }
  0x32   :  { %513 = vmatprep.subr.bf16.mxu1 %v645_v0  ;;  %v523_v45 = vpack.c.bf16 %v247_v44, %v246_v43  ;;  %v249_v47 = vld [vmem:[#allocation6 + $0x58] sm:$0xff]  ;;  %v250_v49 = vld [vmem:[#allocation6 + $0x60] sm:$0xff]  ;;  %v251_v50 = vld [vmem:[#allocation6 + $0x68] sm:$0xff] }
  0x33   :  { %491 = vmatpush3.bf16.msra.mxu0 %v490_v14  ;;  %v526_v48 = vpack.c.bf16 %v249_v47, %v248_v46  ;;  %v529_v51 = vpack.c.bf16 %v251_v50, %v250_v49  ;;  %v252_v52 = vld [vmem:[#allocation6 + $0x70] sm:$0xff]  ;;  %v253_v53 = vld [vmem:[#allocation6 + $0x78] sm:$0xff]  ;;  %v367_v58 = vld [vmem:[%s785_s4] ss:$0 sm:$0xff] }
  0x34   :  { %492 = vmatprep.subr.bf16.mxu0 %v645_v0  ;;  %v532_v54 = vpack.c.bf16 %v253_v53, %v252_v52 }
  0x35   :  { %515 = vmatpush3.bf16.msra.mxu1 %v514_v25 }
  0x36   :  { %516 = vmatprep.subr.bf16.mxu1 %v645_v0 }
  0x37   :  { %494 = vmatpush3.bf16.msra.mxu0 %v493_v22 }
  0x38   :  { %495 = vmatprep.subr.bf16.mxu0 %v645_v0 }
  0x39   :  { %518 = vmatpush3.bf16.msra.mxu1 %v517_v31 }
  0x3a   :  { %519 = vmatprep.subr.bf16.mxu1 %v645_v0 }
  0x3b   :  { %497 = vmatpush3.bf16.msra.mxu0 %v496_v28 }
  0x3c   :  { %498 = vmatprep.subr.bf16.mxu0 %v645_v0 }
  0x3d   :  { %521 = vmatpush3.bf16.msra.mxu1 %v520_v37 }
  0x3e   :  { %522 = vmatprep.subr.bf16.mxu1 %v645_v0 }
  0x3f   :  { %500 = vmatpush3.bf16.msra.mxu0 %v499_v34 }
  0x40   :  { %501 = vmatprep.subr.bf16.mxu0 %v645_v0 }
  0x41   :  { %524 = vmatpush3.bf16.msra.mxu1 %v523_v45 }
  0x42   :  { %525 = vmatprep.subr.bf16.mxu1 %v645_v0 }
  0x43   :  { %503 = vmatpush3.bf16.msra.mxu0 %v502_v38 }
  0x44   :  { %504 = vmatprep.subr.bf16.mxu0 %v645_v0 }
  0x45   :  { %527 = vmatpush3.bf16.msra.mxu1 %v526_v48 }
  0x46   :  { %528 = vmatprep.subr.bf16.mxu1 %v645_v0 }
  0x47   :  { %506 = vmatpush3.bf16.msra.mxu0 %v505_v41 }
  0x49   :  { %530 = vmatpush3.bf16.msra.mxu1 %v529_v51 }
  0x4a   :  { %439 = vmatmul.mubr.f32.vlgmr.msra.gmra.mrb[0].mxu0 %v62_v42  ;;  %531 = vmatprep.subr.bf16.mxu1 %v645_v0 }
  0x4d   :  { %533 = vmatpush3.bf16.msra.mxu1 %v532_v54 }
 0x103   :  { %v224_v55 = vpop.f32.mrb[0].mxu1 }
 0x104   :  { %v447_v56 = vpop.f32.mrb[1].mxu1 }
 0x11d   :  { %v150_v57 = vpop.f32.mrb[0].mxu0 }
 0x11e   :  { %v225_v59 = vadd.f32 %v224_v55, %v150_v57  ;;  %v440_v60 = vpop.f32.mrb[1].mxu0 }
 0x120   :  { %v235_v61 = vadd.f32 %v367_v58, %v225_v59 }
 0x122   :  { %543 = vtanh.f32 %v235_v61 }
 0x12c   :  { %v544_v62 = vpop.eup %543 }
 0x12d   :  { %335 = vst [vmem:[#allocation9] sm:$0xff] %v544_v62  ;;  %481 = vmatmul.mubr.f32.vlgmr.msra.gmra.mrb[2].mxu1 %v544_v62 }
 0x12e   :  { %600 = shalt.err (!%p597_p6)
}
 0x12f   :  { %s601_s4 = scalar_lea.hbm %s789_s8, 128 }
 0x130   :  { %p602_p7 = scmp.ne.s32.totalorder %s789_s8, %s601_s4  ;;  %p605_p8 = scmp.lt.u32.totalorder %s601_s4, %s789_s8 }
 0x132   :  { %p607_p9 = pnand %p605_p8, %p602_p7 }
 0x134   :  { %610 = shalt.err (!%p607_p9)
}
 0x135   :  { %355 = dma.vmem_to_hbm [thread:$0]  %s353_s15, 128, %s789_s8, [#allocation10]   ;;  %v368_v63 = vld [vmem:[%s787_s6] ss:$0 sm:$0xff] }
 0x136   :  { %s649_s27 = smov [#allocation8]  }
 0x137   :  { %s342_s29 = sshll.u32 %s649_s27, 4  ;;  %s343_s29 = int_to_ptr.vmem [resolvable:$true] %s342_s29 }
 0x138   :  { %s611_s3 = scalar_lea.vmem %s343_s29, 128  ;;  %p616_p11 = scmp.lt.s32.totalorder %s343_s29, %s343_s29 }
 0x139   :  { %p612_p10 = scmp.ne.s32.totalorder %s343_s29, %s611_s3  ;;  %p617_p12 = scmp.lt.s32.totalorder %s611_s3, %s611_s3 }
 0x13b   :  { %p618_p13 = por %p617_p12, %p616_p11 }
 0x13d   :  { %p619_p0 = pnand %p618_p13, %p612_p10 }
 0x200   :  { %v327_v0 = vpop.f32.mrb[2].mxu1 }
 0x201   :  { %v328_v1 = vadd.f32 %v368_v63, %v327_v0  ;;  %v482_v2 = vpop.f32.mrb[3].mxu1 }
 0x203   :  { %331 = vst [vmem:[#allocation8] sm:$0xff] %v328_v1 }
 0x204   :  { %622 = shalt.err (!%p619_p0)
}
 0x205   :  { %s623_s5 = scalar_lea.hbm %s788_s7, 128 }
 0x206   :  { %p624_p1 = scmp.ne.s32.totalorder %s788_s7, %s623_s5  ;;  %p627_p2 = scmp.lt.u32.totalorder %s623_s5, %s788_s7 }
 0x208   :  { %p629_p3 = pnand %p627_p2, %p624_p1 }
 0x20a   :  { %632 = shalt.err (!%p629_p3)
}
 0x20b   :  { %345 = dma.vmem_to_hbm [thread:$0]  %s343_s29, 128, %s788_s7, [#allocation5]  }
 0x20c   :  { %637 = dma.done.wait [#allocation5], 128  }
 0x20d   :  { %638 = vsyncadd [#allocation5], 4294967168 }
 0x20e   :  { %639 = dma.done.wait [#allocation10], 128  }
 0x20f   :  { %640 = vsyncadd [#allocation10], 4294967168 }
 0x210   :  { %362 = vsyncpa [#allocation4], 1 }
 0x211   :  { %363 = vsyncpa [#allocation7], 1 }
 0x212   :  { %364 = vsyncpa [#allocation5], 1 }
 0x213   :  { %365 = vsyncpa [#allocation10], 1 }

</bundles_post_ra>
